<compile_context>
chip_gen: v6e
topology: v6e:2x2x1
jax: 0.10.0
libtpu: 0.0.40
codegen_flags: <defaults>
</compile_context>

<pallas_src>
import jax
import jax.numpy as jnp
from jax import lax
from jax.experimental import pallas as pl
from jax.experimental.pallas import tpu as pltpu

EPS = 1e-5
LANE = 128
VMEM_LIMIT = 32 * 1024 * 1024  # safe on v5e/v6e/v7x scoped-VMEM budgets


def _round_up(x, m):
    return ((x + m - 1) // m) * m


def conv_stats_kernel(p_ref, w_ref, y_ref, stats_ref, acc_ref):
    """Pass 1: conv-as-matmul per M-tile + per-channel sum / sum-of-squares.

    p_ref: (TM, Kpad) compute dtype, w_ref: (Kpad, Cpad) compute dtype (resident),
    y_ref: (TM, Cpad) f32 raw conv output, stats_ref: (8, Cpad) f32
    (row 0 = sum, row 1 = sum of squares), acc_ref: (8, Cpad) f32 VMEM scratch.
    """
    i = pl.program_id(0)

    @pl.when(i == 0)
    def _():
        acc_ref[...] = jnp.zeros_like(acc_ref)

    # Conv as matmul on the MXU; f32 accumulation regardless of operand dtype.
    y = jnp.dot(p_ref[...], w_ref[...], preferred_element_type=jnp.float32)
    y_ref[...] = y

    s = jnp.sum(y, axis=0, keepdims=True)        # (1, Cpad)
    sq = jnp.sum(y * y, axis=0, keepdims=True)   # (1, Cpad)
    pad = jnp.zeros((6, y.shape[1]), jnp.float32)
    acc_ref[...] += jnp.concatenate([s, sq, pad], axis=0)

    @pl.when(i == pl.num_programs(0) - 1)
    def _():
        stats_ref[...] = acc_ref[...]


def bn_relu_kernel(y_ref, scale_ref, bias_ref, o_ref):
    """Pass 2: fused per-channel affine (folded BatchNorm) + ReLU, all in f32."""
    o_ref[...] = jnp.maximum(y_ref[...] * scale_ref[...] + bias_ref[...], 0.0)


def block_forward(x_nchw, weight, gamma, beta, *,
                  compute_dtype=jnp.bfloat16, tm_target=512):
    """x_nchw: (N, Cin, H, W); weight: (Cout, Cin, 4, 4) (PyTorch OIHW layout)."""
    N, Cin, H, W = x_nchw.shape
    Cout = weight.shape[0]
    K, S, P = 4, 2, 1
    OH = (H + 2 * P - K) // S + 1
    OW = (W + 2 * P - K) // S + 1
    M = N * OH * OW

    # ---- Reflect padding + im2col (pure layout glue, stays in JAX) ----------
    x_pad = jnp.pad(x_nchw, ((0, 0), (0, 0), (P, P), (P, P)), mode="reflect")
    x_nhwc = jnp.transpose(x_pad, (0, 2, 3, 1))          # (N, H+2, W+2, Cin)
    cols = []
    for kh in range(K):
        for kw in range(K):
            cols.append(x_nhwc[:, kh:kh + S * OH:S, kw:kw + S * OW:S, :])
    patches = jnp.stack(cols, axis=-1)                   # (N,OH,OW,Cin,K*K)
    patches = patches.reshape(M, Cin * K * K)            # matches weight.reshape order

    # ---- Padding to lane-dense / tileable shapes ----------------------------
    KK = Cin * K * K
    Kpad = _round_up(KK, LANE)
    Cpad = _round_up(Cout, LANE)
    TM = min(tm_target, _round_up(M, LANE))              # multiple of 128 (bf16-safe)
    Mpad = _round_up(M, TM)
    num_tiles = Mpad // TM

    patches_p = jnp.pad(patches.astype(compute_dtype),
                        ((0, Mpad - M), (0, Kpad - KK)))
    w_mat = weight.reshape(Cout, KK).T                    # (KK, Cout)
    w_p = jnp.pad(w_mat.astype(compute_dtype),
                  ((0, Kpad - KK), (0, Cpad - Cout)))

    # ---- Pass 1: tiled conv matmul + batch-stat accumulation ----------------
    y_f32, stats = pl.pallas_call(
        conv_stats_kernel,
        out_shape=(jax.ShapeDtypeStruct((Mpad, Cpad), jnp.float32),
                   jax.ShapeDtypeStruct((8, Cpad), jnp.float32)),
        grid_spec=pltpu.PrefetchScalarGridSpec(
            num_scalar_prefetch=0,
            grid=(num_tiles,),
            in_specs=[pl.BlockSpec((TM, Kpad), lambda i: (i, 0)),
                      pl.BlockSpec((Kpad, Cpad), lambda i: (0, 0))],
            out_specs=(pl.BlockSpec((TM, Cpad), lambda i: (i, 0)),
                       pl.BlockSpec((8, Cpad), lambda i: (0, 0))),
            scratch_shapes=[pltpu.VMEM((8, Cpad), jnp.float32)]),
        compiler_params=pltpu.CompilerParams(
            dimension_semantics=("arbitrary",),
            vmem_limit_bytes=VMEM_LIMIT),
    )(patches_p, w_p)

    # ---- Tiny per-channel precompute: fold BN into one scale + one bias -----
    m_f = jnp.float32(M)                                  # real (un-padded) count
    mean = stats[0:1, :] / m_f                            # (1, Cpad)
    var = stats[1:2, :] / m_f - mean * mean               # biased variance (training BN)
    gamma_p = jnp.pad(gamma.astype(jnp.float32).reshape(1, Cout),
                      ((0, 0), (0, Cpad - Cout)))
    beta_p = jnp.pad(beta.astype(jnp.float32).reshape(1, Cout),
                     ((0, 0), (0, Cpad - Cout)))
    scale = gamma_p * lax.rsqrt(var + EPS)                # (1, Cpad)
    bias = beta_p - mean * scale                          # (1, Cpad)

    # ---- Pass 2: normalize + ReLU, fully parallel over M tiles --------------
    out_flat = pl.pallas_call(
        bn_relu_kernel,
        out_shape=jax.ShapeDtypeStruct((Mpad, Cpad), jnp.float32),
        grid_spec=pltpu.PrefetchScalarGridSpec(
            num_scalar_prefetch=0,
            grid=(num_tiles,),
            in_specs=[pl.BlockSpec((TM, Cpad), lambda i: (i, 0)),
                      pl.BlockSpec((1, Cpad), lambda i: (0, 0)),
                      pl.BlockSpec((1, Cpad), lambda i: (0, 0))],
            out_specs=pl.BlockSpec((TM, Cpad), lambda i: (i, 0))),
        compiler_params=pltpu.CompilerParams(
            dimension_semantics=("parallel",),
            vmem_limit_bytes=VMEM_LIMIT),
    )(y_f32, scale, bias)

    # Kernel output is NHWC-flat; transpose to NCHW only to match PyTorch
    # module semantics (skip / fuse downstream if the consumer accepts NHWC).
    out_nhwc = out_flat[:M, :Cout].reshape(N, OH, OW, Cout)
    return jnp.transpose(out_nhwc, (0, 3, 1, 2))


def reference_forward(x_nchw, weight, gamma, beta):
    """Pure-JAX f32 reference for correctness checking."""
    P = 1
    x_pad = jnp.pad(x_nchw, ((0, 0), (0, 0), (P, P), (P, P)), mode="reflect")
    y = lax.conv_general_dilated(
        x_pad.astype(jnp.float32), weight.astype(jnp.float32),
        window_strides=(2, 2), padding="VALID",
        dimension_numbers=("NCHW", "OIHW", "NCHW"))
    mean = jnp.mean(y, axis=(0, 2, 3), keepdims=True)
    var = jnp.mean((y - mean) ** 2, axis=(0, 2, 3), keepdims=True)
    y = (y - mean) * lax.rsqrt(var + EPS)
    y = y * gamma.reshape(1, -1, 1, 1) + beta.reshape(1, -1, 1, 1)
    return jnp.maximum(y, 0.0)


if __name__ == "__main__":
    key = jax.random.PRNGKey(0)
    kx, kw = jax.random.split(key)

    N, Cin, H, W = 2, 4, 16, 16
    Cout = 8

    x = jax.random.normal(kx, (N, Cin, H, W), dtype=jnp.float32)
    weight = 0.1 * jax.random.normal(kw, (Cout, Cin, 4, 4), dtype=jnp.float32)
    # BatchNorm2d default init: weight (gamma) = 1, bias (beta) = 0.
    gamma = jnp.ones((Cout,), dtype=jnp.float32)
    beta = jnp.zeros((Cout,), dtype=jnp.float32)
    # TODO(synk): Dropout(0.5) path unused (use_dropout=False default); not implemented.

    ref = reference_forward(x, weight, gamma, beta)

    # f32 compute path: exact-semantics check at tight tolerance.
    out_f32 = jax.block_until_ready(
        block_forward(x, weight, gamma, beta, compute_dtype=jnp.float32))
    assert out_f32.shape == (N, Cout, H // 2, W // 2), out_f32.shape
    assert jnp.allclose(out_f32, ref, atol=1e-4, rtol=1e-4), \
        float(jnp.max(jnp.abs(out_f32 - ref)))

    # bf16 matmul path (default, MXU-friendly); f32 accumulation & BN math,
    # so only operand-rounding error remains -> loose tolerance vs f32 ref.
    out_bf16 = jax.block_until_ready(block_forward(x, weight, gamma, beta))
    assert out_bf16.shape == (N, Cout, H // 2, W // 2), out_bf16.shape
    assert jnp.allclose(out_bf16, ref, atol=5e-2, rtol=5e-2), \
        float(jnp.max(jnp.abs(out_bf16 - ref)))

    print("KERNEL_OK")
</pallas_src>

<mosaic_0001>
module attributes {stable_mosaic.version = 11 : i64} {
  func.func @conv_stats_kernel(%arg0: i32, %arg1: memref<128x128xf32, #tpu.memory_space<vmem>>, %arg2: memref<128x128xf32, #tpu.memory_space<vmem>>, %arg3: memref<128x128xf32, #tpu.memory_space<vmem>>, %arg4: memref<8x128xf32, #tpu.memory_space<vmem>>, %arg5: memref<8x128xf32, #tpu.memory_space<vmem>>) attributes {dimension_semantics = [#tpu.dimension_semantics<arbitrary>], iteration_bounds = array<i64: 1>, scalar_prefetch = 0 : i64, scratch_operands = 1 : i64, tpu.core_type = #tpu.core_type<tc>, window_params = [{transform_indices = @transform_0, window_bounds = array<i64: 128, 128>}, {pipeline_mode = #tpu.pipeline_mode<synchronous>, transform_indices = @transform_1, window_bounds = array<i64: 128, 128>}, {transform_indices = @transform_2, window_bounds = array<i64: 128, 128>}, {pipeline_mode = #tpu.pipeline_mode<synchronous>, transform_indices = @transform_3, window_bounds = array<i64: 8, 128>}]} {
    %c0_i32 = arith.constant 0 : i32
    %0 = arith.cmpi eq, %arg0, %c0_i32 : i32
    %1 = arith.extui %0 : i1 to i32
    %c0_i32_0 = arith.constant 0 : i32
    %2 = arith.cmpi ne, %1, %c0_i32_0 : i32
    scf.if %2 {
      %cst_15 = arith.constant 0.000000e+00 : f32
      %20 = vector.broadcast %cst_15 : f32 to vector<8x128xf32>
      %c0_16 = arith.constant 0 : index
      %c0_17 = arith.constant 0 : index
      %21 = vector.load %arg5[%c0_16, %c0_17] : memref<8x128xf32, #tpu.memory_space<vmem>>, vector<8x128xf32>
      tpu.vector_store %arg5[%c0_16, %c0_17], %20 {strides = array<i32>} : memref<8x128xf32, #tpu.memory_space<vmem>>, vector<8x128xf32>,
    } else {
    }
    %c0 = arith.constant 0 : index
    %c0_1 = arith.constant 0 : index
    %3 = vector.load %arg1[%c0, %c0_1] : memref<128x128xf32, #tpu.memory_space<vmem>>, vector<128x128xf32>
    %c0_2 = arith.constant 0 : index
    %c0_3 = arith.constant 0 : index
    %4 = vector.load %arg2[%c0_2, %c0_3] : memref<128x128xf32, #tpu.memory_space<vmem>>, vector<128x128xf32>
    %cst = arith.constant dense<0.000000e+00> : vector<128x128xf32>
    %5 = tpu.matmul %3, %4, %cst {dimension_numbers = #tpu.dot_dimension_numbers<[1], [0], [0], [1], [0, 0, 1, 1], [], []>} : vector<128x128xf32>, vector<128x128xf32>, vector<128x128xf32> -> vector<128x128xf32>
    %c0_4 = arith.constant 0 : index
    %c0_5 = arith.constant 0 : index
    %6 = vector.load %arg3[%c0_4, %c0_5] : memref<128x128xf32, #tpu.memory_space<vmem>>, vector<128x128xf32>
    tpu.vector_store %arg3[%c0_4, %c0_5], %5 {strides = array<i32>} : memref<128x128xf32, #tpu.memory_space<vmem>>, vector<128x128xf32>,
    %cst_6 = arith.constant dense<0.000000e+00> : vector<128xf32>
    %7 = vector.multi_reduction <add>, %5, %cst_6 [0] : vector<128x128xf32> to vector<128xf32>
    %8 = vector.shape_cast %7 : vector<128xf32> to vector<1x128xf32>
    %9 = arith.mulf %5, %5 : vector<128x128xf32>
    %cst_7 = arith.constant dense<0.000000e+00> : vector<128xf32>
    %10 = vector.multi_reduction <add>, %9, %cst_7 [0] : vector<128x128xf32> to vector<128xf32>
    %11 = vector.shape_cast %10 : vector<128xf32> to vector<1x128xf32>
    %cst_8 = arith.constant 0.000000e+00 : f32
    %12 = vector.broadcast %cst_8 : f32 to vector<6x128xf32>
    %c0_9 = arith.constant 0 : index
    %c0_10 = arith.constant 0 : index
    %13 = vector.load %arg5[%c0_9, %c0_10] : memref<8x128xf32, #tpu.memory_space<vmem>>, vector<8x128xf32>
    %14 = tpu.concatenate %8, %11, %12 in 0 : vector<1x128xf32>, vector<1x128xf32>, vector<6x128xf32> -> vector<8x128xf32>
    %15 = arith.addf %13, %14 : vector<8x128xf32>
    %c0_11 = arith.constant 0 : index
    %c0_12 = arith.constant 0 : index
    %16 = vector.load %arg5[%c0_11, %c0_12] : memref<8x128xf32, #tpu.memory_space<vmem>>, vector<8x128xf32>
    tpu.vector_store %arg5[%c0_11, %c0_12], %15 {strides = array<i32>} : memref<8x128xf32, #tpu.memory_space<vmem>>, vector<8x128xf32>,
    %c0_i32_13 = arith.constant 0 : i32
    %17 = arith.cmpi eq, %arg0, %c0_i32_13 : i32
    %18 = arith.extui %17 : i1 to i32
    %c0_i32_14 = arith.constant 0 : i32
    %19 = arith.cmpi ne, %18, %c0_i32_14 : i32
    scf.if %19 {
      %c0_15 = arith.constant 0 : index
      %c0_16 = arith.constant 0 : index
      %20 = vector.load %arg5[%c0_15, %c0_16] : memref<8x128xf32, #tpu.memory_space<vmem>>, vector<8x128xf32>
      %c0_17 = arith.constant 0 : index
      %c0_18 = arith.constant 0 : index
      %21 = vector.load %arg4[%c0_17, %c0_18] : memref<8x128xf32, #tpu.memory_space<vmem>>, vector<8x128xf32>
      tpu.vector_store %arg4[%c0_17, %c0_18], %20 {strides = array<i32>} : memref<8x128xf32, #tpu.memory_space<vmem>>, vector<8x128xf32>,
    } else {
    }
    return
  }
  func.func @transform_0(%arg0: i32) -> (i32, i32) {
    %c0_i32 = arith.constant 0 : i32
    %c0_i32_0 = arith.constant 0 : i32
    return %arg0, %c0_i32 : i32, i32
  }
  func.func @transform_1(%arg0: i32) -> (i32, i32) {
    %c0_i32 = arith.constant 0 : i32
    %c0_i32_0 = arith.constant 0 : i32
    %c0_i32_1 = arith.constant 0 : i32
    return %c0_i32, %c0_i32_0 : i32, i32
  }
  func.func @transform_2(%arg0: i32) -> (i32, i32) {
    %c0_i32 = arith.constant 0 : i32
    %c0_i32_0 = arith.constant 0 : i32
    return %arg0, %c0_i32 : i32, i32
  }
  func.func @transform_3(%arg0: i32) -> (i32, i32) {
    %c0_i32 = arith.constant 0 : i32
    %c0_i32_0 = arith.constant 0 : i32
    %c0_i32_1 = arith.constant 0 : i32
    return %c0_i32, %c0_i32_0 : i32, i32
  }
}

</mosaic_0001>

<bundles_post_ra>
// kernel: tpu_custom_call.1
= control target key start
LH: loop header
LB: loop body
LE: loop exit
PB: predicated region body
PF: predicated region fallthrough
CT: control target
= control target key end

     0   :  { %9 = vsyncpa [#allocation4], 0  ;;  %s610_s0 = inlined_call_operand.hbm [shape: f32[128,128], index: 0, kind: input, shape index: {}]   ;;  %s611_s1 = inlined_call_operand.hbm [shape: f32[128,128], index: 1, kind: input, shape index: {}]   ;;  %s612_s2 = inlined_call_operand.hbm [shape: f32[128,128], index: 2, kind: output, shape index: {0}]   ;;  %s613_s3 = inlined_call_operand.hbm [shape: f32[8,128], index: 3, kind: output, shape index: {1}]  }
   0x1   :  { %10 = vsyncpa [#allocation7], 0 }
   0x2   :  { %11 = vsyncpa [#allocation5], 0 }
   0x3   :  { %12 = vsyncpa [#allocation10], 0  ;;  %s557_s12 = smov [#allocation3]  }
   0x4   :  { %s18_s13 = sshll.u32 %s557_s12, 4  ;;  %s19_s13 = int_to_ptr.vmem [resolvable:$true] %s18_s13 }
   0x5   :  { %s477_s14 = scalar_lea.vmem %s19_s13, 2048  ;;  %p482_p1 = scmp.lt.s32.totalorder %s19_s13, %s19_s13 }
   0x6   :  { %p478_p0 = scmp.ne.s32.totalorder %s19_s13, %s477_s14  ;;  %p483_p2 = scmp.lt.s32.totalorder %s477_s14, %s477_s14 }
   0x8   :  { %p484_p3 = por %p483_p2, %p482_p1 }
   0xa   :  { %p485_p4 = pnand %p484_p3, %p478_p0 }
   0xc   :  { %488 = shalt.err (!%p485_p4)
}
   0xd   :  { %s558_s15 = smov 128   ;;  %s559_s16 = smov 8  }
   0xe   :  { %24 = dma.hbm_to_vmem [thread:$0]  %s610_s0, 2048, %s19_s13, [#allocation4], %s558_s15, %s558_s15, %s559_s16  }
   0xf   :  { %s560_s19 = smov [#allocation6]  }
  0x10   :  { %s30_s20 = sshll.u32 %s560_s19, 4  ;;  %s31_s20 = int_to_ptr.vmem [resolvable:$true] %s30_s20 }
  0x11   :  { %s497_s21 = scalar_lea.vmem %s31_s20, 2048  ;;  %p502_p6 = scmp.lt.s32.totalorder %s31_s20, %s31_s20 }
  0x12   :  { %p498_p5 = scmp.ne.s32.totalorder %s31_s20, %s497_s21  ;;  %p503_p7 = scmp.lt.s32.totalorder %s497_s21, %s497_s21 }
  0x14   :  { %p504_p8 = por %p503_p7, %p502_p6 }
  0x16   :  { %p505_p9 = pnand %p504_p8, %p498_p5 }
  0x18   :  { %508 = shalt.err (!%p505_p9)
}
  0x19   :  { %36 = dma.hbm_to_vmem [thread:$0]  %s611_s1, 2048, %s31_s20, [#allocation7], %s558_s15, %s558_s15, %s559_s16  }
  0x1a   :  { %549 = dma.done.wait [#allocation4], 2048  }
  0x1b   :  { %550 = vsyncadd [#allocation4], 4294965248 }
  0x1c   :  { %551 = dma.done.wait [#allocation7], 2048  }
  0x1d   :  { %552 = vsyncadd [#allocation7], 4294965248  ;;  %v79_v0 = vld [vmem:[#allocation6 + $0x78] sm:$0xff]  ;;  %v78_v1 = vld [vmem:[#allocation6 + $0x70] sm:$0xff]  ;;  %s561_s0 = smov [#allocation8]  }
  0x1e   :  { %375 = vmatprep.subr.mxu0 %v79_v0  ;;  %431 = vmatprep.subr.mxu1 %v79_v0  ;;  %v77_v2 = vld [vmem:[#allocation6 + $0x68] sm:$0xff]  ;;  %v76_v3 = vld [vmem:[#allocation6 + $0x60] sm:$0xff]  ;;  %v75_v4 = vld [vmem:[#allocation6 + $0x58] sm:$0xff]  ;;  %s316_s1 = sshll.u32 %s561_s0, 4  ;;  %s317_s1 = int_to_ptr.vmem [resolvable:$true] %s316_s1 }
  0x1f   :  { %376 = vmatpush3.msra.mxu0 %v79_v0  ;;  %447 = vmatpush3.msra.mxu1 %v79_v0  ;;  %v74_v5 = vld [vmem:[#allocation6 + $0x50] sm:$0xff]  ;;  %v73_v6 = vld [vmem:[#allocation6 + $0x48] sm:$0xff]  ;;  %v72_v7 = vld [vmem:[#allocation6 + $0x40] sm:$0xff]  ;;  %s509_s24 = scalar_lea.vmem %s317_s1, 2048  ;;  %p514_p11 = scmp.lt.s32.totalorder %s317_s1, %s317_s1 }
  0x20   :  { %377 = vmatprep.subr.mxu0 %v78_v1  ;;  %432 = vmatprep.subr.mxu1 %v78_v1  ;;  %v71_v8 = vld [vmem:[#allocation6 + $0x38] sm:$0xff]  ;;  %v70_v9 = vld [vmem:[#allocation6 + $0x30] sm:$0xff]  ;;  %v48_v10 = vld [vmem:[#allocation3] sm:$0xff]  ;;  %p510_p10 = scmp.ne.s32.totalorder %s317_s1, %s509_s24  ;;  %p515_p12 = scmp.lt.s32.totalorder %s509_s24, %s509_s24 }
  0x21   :  { %378 = vmatpush3.msra.mxu0 %v78_v1  ;;  %448 = vmatpush3.msra.mxu1 %v78_v1  ;;  %v69_v11 = vld [vmem:[#allocation6 + $0x28] sm:$0xff]  ;;  %v68_v12 = vld [vmem:[#allocation6 + $0x20] sm:$0xff]  ;;  %v67_v13 = vld [vmem:[#allocation6 + $0x18] sm:$0xff] }
  0x22   :  { %379 = vmatprep.subr.mxu0 %v77_v2  ;;  %433 = vmatprep.subr.mxu1 %v77_v2  ;;  %v66_v14 = vld [vmem:[#allocation6 + $0x10] sm:$0xff]  ;;  %v65_v15 = vld [vmem:[#allocation6 + $0x8] sm:$0xff]  ;;  %v64_v16 = vld [vmem:[#allocation6] sm:$0xff]  ;;  %p516_p13 = por %p515_p12, %p514_p11 }
  0x23   :  { %380 = vmatpush3.msra.mxu0 %v77_v2  ;;  %449 = vmatpush3.msra.mxu1 %v77_v2  ;;  %v49_v17 = vld [vmem:[#allocation3 + $0x8] sm:$0xff]  ;;  %v50_v18 = vld [vmem:[#allocation3 + $0x10] sm:$0xff]  ;;  %v56_v19 = vld [vmem:[#allocation3 + $0x40] sm:$0xff] }
  0x24   :  { %381 = vmatprep.subr.mxu0 %v76_v3  ;;  %434 = vmatprep.subr.mxu1 %v76_v3  ;;  %v57_v20 = vld [vmem:[#allocation3 + $0x48] sm:$0xff]  ;;  %v58_v21 = vld [vmem:[#allocation3 + $0x50] sm:$0xff]  ;;  %v51_v22 = vld [vmem:[#allocation3 + $0x18] sm:$0xff]  ;;  %p517_p0 = pnand %p516_p13, %p510_p10 }
  0x25   :  { %382 = vmatpush3.msra.mxu0 %v76_v3  ;;  %450 = vmatpush3.msra.mxu1 %v76_v3  ;;  %v52_v23 = vld [vmem:[#allocation3 + $0x20] sm:$0xff]  ;;  %v59_v24 = vld [vmem:[#allocation3 + $0x58] sm:$0xff]  ;;  %v53_v26 = vld [vmem:[#allocation3 + $0x28] sm:$0xff] }
  0x26   :  { %383 = vmatprep.subr.mxu0 %v75_v4  ;;  %435 = vmatprep.subr.mxu1 %v75_v4  ;;  %v60_v25 = vld [vmem:[#allocation3 + $0x60] sm:$0xff]  ;;  %v54_v27 = vld [vmem:[#allocation3 + $0x30] sm:$0xff]  ;;  %v61_v28 = vld [vmem:[#allocation3 + $0x68] sm:$0xff] }
  0x27   :  { %384 = vmatpush3.msra.mxu0 %v75_v4  ;;  %451 = vmatpush3.msra.mxu1 %v75_v4  ;;  %v62_v29 = vld [vmem:[#allocation3 + $0x70] sm:$0xff]  ;;  %v55_v30 = vld [vmem:[#allocation3 + $0x38] sm:$0xff] }
  0x28   :  { %385 = vmatprep.subr.mxu0 %v74_v5  ;;  %436 = vmatprep.subr.mxu1 %v74_v5  ;;  %v63_v31 = vld [vmem:[#allocation3 + $0x78] sm:$0xff] }
  0x29   :  { %386 = vmatpush3.msra.mxu0 %v74_v5  ;;  %452 = vmatpush3.msra.mxu1 %v74_v5 }
  0x2a   :  { %387 = vmatprep.subr.mxu0 %v73_v6  ;;  %437 = vmatprep.subr.mxu1 %v73_v6 }
  0x2b   :  { %388 = vmatpush3.msra.mxu0 %v73_v6  ;;  %453 = vmatpush3.msra.mxu1 %v73_v6 }
  0x2c   :  { %389 = vmatprep.subr.mxu0 %v72_v7  ;;  %438 = vmatprep.subr.mxu1 %v72_v7 }
  0x2d   :  { %390 = vmatpush3.msra.mxu0 %v72_v7  ;;  %454 = vmatpush3.msra.mxu1 %v72_v7 }
  0x2e   :  { %391 = vmatprep.subr.mxu0 %v71_v8  ;;  %439 = vmatprep.subr.mxu1 %v71_v8 }
  0x2f   :  { %392 = vmatpush3.msra.mxu0 %v71_v8  ;;  %455 = vmatpush3.msra.mxu1 %v71_v8 }
  0x30   :  { %393 = vmatprep.subr.mxu0 %v70_v9  ;;  %407 = vmatprep.mubr.f32.mxu0 %v48_v10 }
  0x31   :  { %394 = vmatpush3.msra.mxu0 %v70_v9  ;;  %440 = vmatprep.subr.mxu1 %v70_v9 }
  0x32   :  { %395 = vmatprep.subr.mxu0 %v69_v11  ;;  %456 = vmatpush3.msra.mxu1 %v70_v9 }
  0x33   :  { %396 = vmatpush3.msra.mxu0 %v69_v11  ;;  %441 = vmatprep.subr.mxu1 %v69_v11 }
  0x34   :  { %397 = vmatprep.subr.mxu0 %v68_v12  ;;  %457 = vmatpush3.msra.mxu1 %v69_v11 }
  0x35   :  { %398 = vmatpush3.msra.mxu0 %v68_v12  ;;  %442 = vmatprep.subr.mxu1 %v68_v12 }
  0x36   :  { %399 = vmatprep.subr.mxu0 %v67_v13  ;;  %458 = vmatpush3.msra.mxu1 %v68_v12 }
  0x37   :  { %400 = vmatpush3.msra.mxu0 %v67_v13  ;;  %443 = vmatprep.subr.mxu1 %v67_v13 }
  0x38   :  { %401 = vmatprep.subr.mxu0 %v66_v14  ;;  %459 = vmatpush3.msra.mxu1 %v67_v13 }
  0x39   :  { %402 = vmatpush3.msra.mxu0 %v66_v14  ;;  %444 = vmatprep.subr.mxu1 %v66_v14 }
  0x3a   :  { %403 = vmatprep.subr.mxu0 %v65_v15  ;;  %460 = vmatpush3.msra.mxu1 %v66_v14 }
  0x3b   :  { %404 = vmatpush3.msra.mxu0 %v65_v15  ;;  %445 = vmatprep.subr.mxu1 %v65_v15 }
  0x3c   :  { %405 = vmatprep.subr.mxu0 %v64_v16  ;;  %461 = vmatpush3.msra.mxu1 %v65_v15 }
  0x3d   :  { %406 = vmatpush3.msra.mxu0 %v64_v16  ;;  %446 = vmatprep.subr.mxu1 %v64_v16 }
  0x3e   :  { %408 = vmatmul.mubr.f32.vlgmr.msra.gmra.mxu0 %v49_v17  ;;  %462 = vmatpush3.msra.mxu1 %v64_v16 }
  0x3f   :  { %410 = vmatprep.mubr.f32.mxu0 %v50_v18  ;;  %419 = vmatprep.mubr.f32.mxu1 %v56_v19 }
  0x40   :  { %420 = vmatmul.mubr.f32.vlgmr.msra.gmra.mxu1 %v57_v20 }
  0x41   :  { %422 = vmatprep.mubr.f32.mxu1 %v58_v21 }
  0x42   :  { %411 = vmatmul.mubr.f32.gmra.mxu0 %v51_v22 }
  0x43   :  { %413 = vmatprep.mubr.f32.mxu0 %v52_v23 }
  0x44   :  { %423 = vmatmul.mubr.f32.gmra.mxu1 %v59_v24 }
  0x45   :  { %425 = vmatprep.mubr.f32.mxu1 %v60_v25 }
  0x46   :  { %414 = vmatmul.mubr.f32.gmra.mxu0 %v53_v26 }
  0x47   :  { %416 = vmatprep.mubr.f32.mxu0 %v54_v27 }
  0x48   :  { %426 = vmatmul.mubr.f32.gmra.mxu1 %v61_v28 }
  0x49   :  { %428 = vmatprep.mubr.f32.mxu1 %v62_v29 }
  0x4a   :  { %417 = vmatmul.mubr.f32.gmra.mxu0 %v55_v30 }
  0x4c   :  { %429 = vmatmul.mubr.f32.gmra.mxu1 %v63_v31 }
  0xfe   :  { %v409_v32 = vpop.f32.mrf.mxu0 }
  0xff   :  { %226 = vst [vmem:[#allocation8 + $0x8] sm:$0xff] %v409_v32  ;;  %v263_v38 = vmul.f32 %v409_v32, %v409_v32 }
 0x100   :  { %v146_v33 = vpop.f32.mrf.mxu0  ;;  %v595_v34 = vpop.f32.mrf.mxu1 }
 0x101   :  { %225 = vst [vmem:[#allocation8] sm:$0xff] %v146_v33  ;;  %v262_v35 = vmul.f32 %v146_v33, %v146_v33  ;;  %234 = vst [vmem:[#allocation8 + $0x48] sm:$0xff] %v595_v34  ;;  %v241_v39 = vadd.f32 %v409_v32, %v146_v33 }
 0x102   :  { %v412_v36 = vpop.f32.mrf.mxu0  ;;  %v186_v37 = vpop.f32.mrf.mxu1 }
 0x103   :  { %228 = vst [vmem:[#allocation8 + $0x18] sm:$0xff] %v412_v36  ;;  %233 = vst [vmem:[#allocation8 + $0x40] sm:$0xff] %v186_v37  ;;  %v278_v42 = vadd.f32 %v263_v38, %v262_v35  ;;  %v265_v47 = vmul.f32 %v412_v36, %v412_v36 }
 0x104   :  { %v156_v40 = vpop.f32.mrf.mxu0  ;;  %v424_v41 = vpop.f32.mrf.mxu1 }
 0x105   :  { %227 = vst [vmem:[#allocation8 + $0x10] sm:$0xff] %v156_v40  ;;  %v242_v43 = vadd.f32 %v241_v39, %v156_v40  ;;  %v264_v44 = vmul.f32 %v156_v40, %v156_v40  ;;  %236 = vst [vmem:[#allocation8 + $0x58] sm:$0xff] %v424_v41 }
 0x106   :  { %v415_v45 = vpop.f32.mrf.mxu0  ;;  %v196_v46 = vpop.f32.mrf.mxu1 }
 0x107   :  { %v279_v48 = vadd.f32 %v278_v42, %v264_v44  ;;  %230 = vst [vmem:[#allocation8 + $0x28] sm:$0xff] %v415_v45  ;;  %v243_v49 = vadd.f32 %v412_v36, %v242_v43  ;;  %235 = vst [vmem:[#allocation8 + $0x50] sm:$0xff] %v196_v46  ;;  %v267_v57 = vmul.f32 %v415_v45, %v415_v45 }
 0x108   :  { %v166_v50 = vpop.f32.mrf.mxu0  ;;  %v427_v51 = vpop.f32.mrf.mxu1 }
 0x109   :  { %229 = vst [vmem:[#allocation8 + $0x20] sm:$0xff] %v166_v50  ;;  %v244_v52 = vadd.f32 %v243_v49, %v166_v50  ;;  %v266_v53 = vmul.f32 %v166_v50, %v166_v50  ;;  %v280_v54 = vadd.f32 %v279_v48, %v265_v47  ;;  %238 = vst [vmem:[#allocation8 + $0x68] sm:$0xff] %v427_v51 }
 0x10a   :  { %v418_v55 = vpop.f32.mrf.mxu0  ;;  %v206_v56 = vpop.f32.mrf.mxu1 }
 0x10b   :  { %v281_v58 = vadd.f32 %v280_v54, %v266_v53  ;;  %232 = vst [vmem:[#allocation8 + $0x38] sm:$0xff] %v418_v55  ;;  %v245_v59 = vadd.f32 %v415_v45, %v244_v52  ;;  %237 = vst [vmem:[#allocation8 + $0x60] sm:$0xff] %v206_v56  ;;  %v269_v2 = vmul.f32 %v418_v55, %v418_v55 }
 0x10c   :  { %v176_v60 = vpop.f32.mrf.mxu0  ;;  %v430_v61 = vpop.f32.mrf.mxu1 }
 0x10d   :  { %231 = vst [vmem:[#allocation8 + $0x30] sm:$0xff] %v176_v60  ;;  %v246_v62 = vadd.f32 %v245_v59, %v176_v60  ;;  %v268_v63 = vmul.f32 %v176_v60, %v176_v60  ;;  %v282_v0 = vadd.f32 %v281_v58, %v267_v57  ;;  %240 = vst [vmem:[#allocation8 + $0x78] sm:$0xff] %v430_v61 }
 0x10e   :  { %v216_v1 = vpop.f32.mrf.mxu1 }
 0x10f   :  { %v247_v3 = vadd.f32 %v418_v55, %v246_v62  ;;  %v283_v4 = vadd.f32 %v282_v0, %v268_v63  ;;  %239 = vst [vmem:[#allocation8 + $0x70] sm:$0xff] %v216_v1 }
 0x110   :  { %520 = shalt.err (!%p517_p0)
}
 0x111   :  { %322 = dma.vmem_to_hbm [thread:$0]  %s317_s1, 2048, %s612_s2, [#allocation5], %s558_s15, %s558_s15, %s559_s16   ;;  %v284_v5 = vadd.f32 %v283_v4, %v269_v2  ;;  %v248_v6 = vadd.f32 %v247_v3, %v186_v37  ;;  %v270_v7 = vmul.f32 %v186_v37, %v186_v37  ;;  %v271_v8 = vmul.f32 %v595_v34, %v595_v34 }
 0x112   :  { %v272_v12 = vmul.f32 %v196_v46, %v196_v46  ;;  %v273_v14 = vmul.f32 %v424_v41, %v424_v41  ;;  %v274_v18 = vmul.f32 %v206_v56, %v206_v56  ;;  %v275_v20 = vmul.f32 %v427_v51, %v427_v51  ;;  %s562_s2 = smov [#allocation9]  }
 0x113   :  { %v285_v9 = vadd.f32 %v284_v5, %v270_v7  ;;  %v249_v10 = vadd.f32 %v595_v34, %v248_v6  ;;  %v276_v24 = vmul.f32 %v216_v1, %v216_v1  ;;  %v277_v26 = vmul.f32 %v430_v61, %v430_v61  ;;  %s329_s27 = sshll.u32 %s562_s2, 4  ;;  %s330_s27 = int_to_ptr.vmem [resolvable:$true] %s329_s27 }
 0x114   :  { %vm300_vm0 = vcmask 1040384   ;;  %vm302_vm1 = vcmask 1041408   ;;  %s529_s28 = scalar_lea.vmem %s330_s27, 128  ;;  %p534_p2 = scmp.lt.s32.totalorder %s330_s27, %s330_s27 }
 0x115   :  { %v250_v11 = vadd.f32 %v249_v10, %v196_v46  ;;  %v286_v13 = vadd.f32 %v285_v9, %v271_v8  ;;  %p530_p1 = scmp.ne.s32.totalorder %s330_s27, %s529_s28  ;;  %p535_p3 = scmp.lt.s32.totalorder %s529_s28, %s529_s28 }
 0x117   :  { %v287_v15 = vadd.f32 %v286_v13, %v272_v12  ;;  %v251_v16 = vadd.f32 %v424_v41, %v250_v11  ;;  %p536_p4 = por %p535_p3, %p534_p2 }
 0x119   :  { %v252_v17 = vadd.f32 %v251_v16, %v206_v56  ;;  %v288_v19 = vadd.f32 %v287_v15, %v273_v14  ;;  %p537_p5 = pnand %p536_p4, %p530_p1 }
 0x11b   :  { %v289_v21 = vadd.f32 %v288_v19, %v274_v18  ;;  %v253_v22 = vadd.f32 %v427_v51, %v252_v17 }
 0x11d   :  { %v254_v23 = vadd.f32 %v253_v22, %v216_v1  ;;  %v290_v25 = vadd.f32 %v289_v21, %v275_v20 }
 0x11f   :  { %v255_v27 = vadd.f32 %v430_v61, %v254_v23  ;;  %v291_v28 = vadd.f32 %v290_v25, %v276_v24 }
 0x121   :  { %v256_v29 = vrot.slane %v255_v27, 4  ;;  %v292_v30 = vadd.f32 %v291_v28, %v277_v26 }
 0x123   :  { %v257_v31 = vadd.f32 %v256_v29, %v255_v27  ;;  %v293_v32 = vrot.slane %v292_v30, 4 }
 0x125   :  { %v258_v33 = vrot.slane %v257_v31, 2  ;;  %v294_v34 = vadd.f32 %v293_v32, %v292_v30 }
 0x127   :  { %v259_v35 = vadd.f32 %v258_v33, %v257_v31  ;;  %v295_v36 = vrot.slane %v294_v34, 2 }
 0x129   :  { %v260_v37 = vrot.slane %v259_v35, 1  ;;  %v296_v38 = vadd.f32 %v295_v36, %v294_v34 }
 0x12b   :  { %v297_v39 = vrot.slane %v296_v38, 1  ;;  %v261_v40 = vadd.f32 %v260_v37, %v259_v35 }
 0x12d   :  { %v298_v41 = vadd.f32 %v297_v39, %v296_v38 }
 0x12f   :  { %v301_v42 = vsel %vm300_vm0, %v261_v40, %v298_v41 }
 0x130   :  { %v303_v43 = vsel %vm302_vm1, %v301_v42, 0.0 }
 0x131   :  { %310 = vst [vmem:[#allocation9] sm:$0xff] %v303_v43 }
 0x132   :  { %540 = shalt.err (!%p537_p5)
}
 0x133   :  { %332 = dma.vmem_to_hbm [thread:$0]  %s330_s27, 128, %s613_s3, [#allocation10]  }
 0x134   :  { %553 = dma.done.wait [#allocation5], 2048  }
 0x135   :  { %554 = vsyncadd [#allocation5], 4294965248 }
 0x136   :  { %555 = dma.done.wait [#allocation10], 128  }
 0x137   :  { %556 = vsyncadd [#allocation10], 4294967168 }
 0x138   :  { %339 = vsyncpa [#allocation4], 1 }
 0x139   :  { %340 = vsyncpa [#allocation7], 1 }
 0x13a   :  { %341 = vsyncpa [#allocation5], 1 }
 0x13b   :  { %342 = vsyncpa [#allocation10], 1 }

</bundles_post_ra>
